<compile_context>
chip_gen: v6e
topology: v6e:2x2x1
jax: 0.10.0
libtpu: 0.0.40
codegen_flags: <defaults>
</compile_context>

<pallas_src>
import functools

import jax
import jax.numpy as jnp
from jax import lax
from jax.experimental import pallas as pl
from jax.experimental.pallas import tpu as pltpu


def _project_attention_kernel(i_ref, v_ref, wi_ref, bi_ref, out_ref, *, valid_l):
    """One batch tile per grid step.

    i_ref : (TB, Lp, Dip)  bf16 image/region features (L and feature dims zero-padded)
    v_ref : (TB, Hp)       f32, gated_tanh(question) * w_lc (hoisted to the wrapper)
    wi_ref: (Dip, 2*Hp)    bf16 fused [tanh-linear | gate-linear] image weights
    bi_ref: (1, 2*Hp)      f32 fused image biases
    out_ref: (TB, Lp)      f32 attention weights, softmax over the (padded) L axis
    """
    TB, Lp, Dip = i_ref.shape
    Hp = v_ref.shape[1]

    # ---- GatedTanh(image_feat): one flattened (TB*Lp, Dip) @ (Dip, 2Hp) bf16 MXU matmul,
    #      f32 accumulation; gating math in f32. ----
    x_i = i_ref[...].reshape(TB * Lp, Dip)
    pre = jnp.dot(x_i, wi_ref[...], preferred_element_type=jnp.float32) + bi_ref[...]
    fc, gate = pre[:, :Hp], pre[:, Hp:]
    # sigmoid(x) = 0.5 * tanh(0.5 * x) + 0.5 : single EUP tanh, no f32 divide chain.
    image_fa = jnp.tanh(fc) * (0.5 * jnp.tanh(0.5 * gate) + 0.5)            # (TB*Lp, Hp)

    # ---- lc (Linear(H, 1)) folded into v: VPU multiply + lane reduction.
    #      lc bias dropped: softmax over L is invariant to a per-row constant shift. ----
    logits = jnp.sum(image_fa.reshape(TB, Lp, Hp) * v_ref[...][:, None, :], axis=-1)

    # ---- Mask padded region positions (their logits are nonzero through the biases). ----
    pos = lax.broadcasted_iota(jnp.int32, (TB, Lp), 1)
    logits = jnp.where(pos < valid_l, logits, jnp.float32(-1e30))

    # ---- Softmax over L (lane axis). Exact per-row reciprocal so rows sum to 1. ----
    m = jnp.max(logits, axis=-1, keepdims=True)                             # (TB, 1)
    e = jnp.exp(logits - m)                                                 # (TB, Lp)
    s = jnp.sum(e, axis=-1, keepdims=True)                                  # (TB, 1)
    out_ref[...] = e * (1.0 / s)


def _round_up(x, m):
    return (x + m - 1) // m * m


def _vmem_capacity_bytes():
    try:
        cap = pltpu.get_tpu_info().vmem_capacity_bytes
        if cap:
            return int(cap)
    except Exception:
        pass
    return 64 * 1024 * 1024  # conservative default (v7x per-TensorCore VMEM)


def _pick_batch_tile(B, Lp, Dip, Hp, vmem_capacity_bytes):
    """Largest batch tile TB such that: TB divides B; TB == B or TB % 8 == 0 (so the 2-D
    (TB, Hp)/(TB, Lp) blocks respect the (8,128) sublane rule); the per-step working set
    (double-buffered activation blocks + single-buffered weights + f32 temporaries) fits a
    conservative share of VMEM; and, when possible, the grid keeps >= 2 steps so a 2-core
    chip (v7x megacore) has something to split."""
    budget = int(0.45 * vmem_capacity_bytes)
    weight_bytes = 2 * Dip * 2 * Hp + 4 * 2 * Hp          # bf16 wi + f32 bi, Buffered(1)

    def step_bytes(tb):
        img = 2 * tb * Lp * Dip * 2       # bf16 image block, double-buffered
        vbk = 4 * tb * Hp * 2             # f32 question-vector block, double-buffered
        out = 4 * tb * Lp * 2             # f32 output block, double-buffered
        tmp = 4 * tb * Lp * 3 * Hp        # f32 pre-activations + gated activations
        return img + vbk + out + tmp

    cands = [d for d in range(1, B + 1) if B % d == 0 and (d == B or d % 8 == 0)]
    fitting = [d for d in cands if weight_bytes + step_bytes(d) <= budget]
    if not fitting:
        return min(cands)                 # nothing fits the budget: smallest legal tile
    multi_step = [d for d in fitting if B // d >= 2]
    return max(multi_step) if multi_step else max(fitting)


def project_attention(image_feat, question_embedding, params, *, batch_tile=None):
    """image_feat: (B, L, Di) f32, question_embedding: (B, Dq) f32.

    params use (in, out) weight layout (transpose of torch nn.Linear storage):
      w_img_fc/b_img_fc, w_img_gate/b_img_gate : GatedTanh over image features
      w_txt_fc/b_txt_fc, w_txt_gate/b_txt_gate : GatedTanh over question embedding
      w_lc (H, 1), b_lc (1,)                   : nn.Linear(hidden, 1)
    Returns attention weights broadcast to image_feat.shape, matching forward().
    """
    B, L, Di = image_feat.shape
    H = params["w_lc"].shape[0]

    LANE = 128
    Dip, Hp, Lp = _round_up(Di, LANE), _round_up(H, LANE), _round_up(L, LANE)

    def padw(w, rows, cols):
        w = w.astype(jnp.float32)
        return jnp.pad(w, ((0, rows - w.shape[0]), (0, cols - w.shape[1])))

    def padb(b, cols):
        b = b.astype(jnp.float32).reshape(1, -1)
        return jnp.pad(b, ((0, 0), (0, cols - b.shape[1])))

    # Fused image GatedTanh weights: [tanh-linear | gate-linear] -> one (Dip, 2Hp) matmul.
    # bf16 weights for the MXU; biases stay f32 (added after f32 accumulation).
    wi = jnp.concatenate([padw(params["w_img_fc"], Dip, Hp),
                          padw(params["w_img_gate"], Dip, Hp)],
                         axis=1).astype(jnp.bfloat16)                       # (Dip, 2Hp)
    bi = jnp.concatenate([padb(params["b_img_fc"], Hp),
                          padb(params["b_img_gate"], Hp)], axis=1)          # (1, 2Hp) f32

    # Question branch hoisted out of the kernel: one full-batch f32 XLA matmul is strictly
    # more MXU-efficient than an M=tb matmul per grid step, and it removes the (Dqp, 2Hp)
    # weight block (double-buffered) from VMEM entirely.
    q = question_embedding.astype(jnp.float32)
    question_fa = (jnp.tanh(q @ params["w_txt_fc"] + params["b_txt_fc"]) *
                   jax.nn.sigmoid(q @ params["w_txt_gate"] + params["b_txt_gate"]))  # (B, H)
    v = question_fa * params["w_lc"].astype(jnp.float32).reshape(1, H)               # (B, H)
    v = jnp.pad(v, ((0, 0), (0, Hp - H)))                                            # (B, Hp)
    # b_lc intentionally not passed: softmax over L is invariant to a per-row constant.

    i_p = jnp.pad(image_feat, ((0, 0), (0, Lp - L), (0, Dip - Di))).astype(jnp.bfloat16)

    vmem_cap = _vmem_capacity_bytes()
    tb = batch_tile or _pick_batch_tile(B, Lp, Dip, Hp, vmem_cap)
    assert B % tb == 0 and (tb == B or tb % 8 == 0), "invalid batch_tile"
    grid = (B // tb,)
    vmem_limit = max(32 * 1024 * 1024, min(int(0.8 * vmem_cap), 100 * 1024 * 1024))

    # TODO(synk): for production hidden sizes (Hp >= ~2048) add a second ("arbitrary") grid
    # axis over H chunks with a VMEM logits accumulator so the (Dip, 2Hp) weight block never
    # exceeds VMEM; not needed at these shapes.
    kernel = functools.partial(_project_attention_kernel, valid_l=L)
    attn = pl.pallas_call(
        kernel,
        out_shape=jax.ShapeDtypeStruct((B, Lp), jnp.float32),
        grid=grid,
        in_specs=[
            pl.BlockSpec((tb, Lp, Dip), lambda b: (b, 0, 0)),      # image feats (bf16)
            pl.BlockSpec((tb, Hp), lambda b: (b, 0)),              # per-row question vector
            pl.BlockSpec((Dip, 2 * Hp), lambda b: (0, 0),
                         pipeline_mode=pl.Buffered(1)),            # grid-invariant weights
            pl.BlockSpec((1, 2 * Hp), lambda b: (0, 0),
                         pipeline_mode=pl.Buffered(1)),            # grid-invariant biases
        ],
        out_specs=pl.BlockSpec((tb, Lp), lambda b: (b, 0)),        # lane-dense attention
        compiler_params=pltpu.CompilerParams(
            dimension_semantics=("parallel",),
            vmem_limit_bytes=vmem_limit),
    )(i_p, v, wi, bi)

    attn = attn[:, :L]                                             # drop padded L positions
    # forward() expands the (B, L, 1) attention over the image feature axis.
    return jnp.broadcast_to(attn[:, :, None], image_feat.shape)


def _reference(image_feat, question_embedding, params):
    def gated_tanh(x, w_fc, b_fc, w_gate, b_gate):
        return jnp.tanh(x @ w_fc + b_fc) * jax.nn.sigmoid(x @ w_gate + b_gate)

    image_fa = gated_tanh(image_feat, params["w_img_fc"], params["b_img_fc"],
                          params["w_img_gate"], params["b_img_gate"])          # (B, L, H)
    question_fa = gated_tanh(question_embedding, params["w_txt_fc"], params["b_txt_fc"],
                             params["w_txt_gate"], params["b_txt_gate"])       # (B, H)
    joint = image_fa * question_fa[:, None, :]
    raw = joint @ params["w_lc"] + params["b_lc"]                              # (B, L, 1)
    attn = jax.nn.softmax(raw, axis=1)
    return jnp.broadcast_to(attn, image_feat.shape)


if __name__ == "__main__":
    # Small shapes implied by the forward: image_feat (B, L, Di), question_embedding (B, Dq).
    B, L, Di, Dq, H = 2, 16, 32, 32, 32

    key = jax.random.PRNGKey(0)
    ks = jax.random.split(key, 12)
    image_feat = jax.random.normal(ks[0], (B, L, Di), dtype=jnp.float32)
    question_embedding = jax.random.normal(ks[1], (B, Dq), dtype=jnp.float32)

    s = 0.1
    params = {
        "w_img_fc":   s * jax.random.normal(ks[2], (Di, H), dtype=jnp.float32),
        "b_img_fc":   s * jax.random.normal(ks[3], (H,), dtype=jnp.float32),
        "w_img_gate": s * jax.random.normal(ks[4], (Di, H), dtype=jnp.float32),
        "b_img_gate": s * jax.random.normal(ks[5], (H,), dtype=jnp.float32),
        "w_txt_fc":   s * jax.random.normal(ks[6], (Dq, H), dtype=jnp.float32),
        "b_txt_fc":   s * jax.random.normal(ks[7], (H,), dtype=jnp.float32),
        "w_txt_gate": s * jax.random.normal(ks[8], (Dq, H), dtype=jnp.float32),
        "b_txt_gate": s * jax.random.normal(ks[9], (H,), dtype=jnp.float32),
        "w_lc":       s * jax.random.normal(ks[10], (H, 1), dtype=jnp.float32),
        "b_lc":       s * jax.random.normal(ks[11], (1,), dtype=jnp.float32),
    }

    out = project_attention(image_feat, question_embedding, params)
    out = jax.block_until_ready(out)

    ref = _reference(image_feat, question_embedding, params)
    assert out.shape == image_feat.shape, f"bad output shape {out.shape}"
    # Tolerance covers bf16 matmul inputs (f32 accumulation) and the dropped (softmax-
    # invariant) lc bias; attention probabilities match the f32 reference to ~1e-4.
    assert jnp.allclose(out, ref, atol=2e-3, rtol=2e-3), "mismatch vs reference"
    # Exact per-row reciprocal in the kernel => rows sum to 1 to f32 precision.
    assert jnp.allclose(jnp.sum(out[:, :, 0], axis=1), 1.0, atol=1e-3), "softmax not normalized"

    print("KERNEL_OK")
</pallas_src>

<mosaic_0001>
module attributes {stable_mosaic.version = 11 : i64} {
  func.func @_project_attention_kernel(%arg0: i32, %arg1: memref<2x128x128xbf16, #tpu.memory_space<vmem>>, %arg2: memref<2x128xf32, #tpu.memory_space<vmem>>, %arg3: memref<128x256xbf16, #tpu.memory_space<vmem>>, %arg4: memref<1x256xf32, #tpu.memory_space<vmem>>, %arg5: memref<2x128xf32, #tpu.memory_space<vmem>>) attributes {dimension_semantics = [#tpu.dimension_semantics<parallel>], iteration_bounds = array<i64: 1>, scalar_prefetch = 0 : i64, scratch_operands = 0 : i64, tpu.core_type = #tpu.core_type<tc>, window_params = [{transform_indices = @transform_0, window_bounds = array<i64: 2, 128, 128>}, {transform_indices = @transform_1, window_bounds = array<i64: 2, 128>}, {pipeline_mode = #tpu.pipeline_mode<synchronous>, transform_indices = @transform_2, window_bounds = array<i64: 128, 256>}, {pipeline_mode = #tpu.pipeline_mode<synchronous>, transform_indices = @transform_3, window_bounds = array<i64: 1, 256>}, {transform_indices = @transform_4, window_bounds = array<i64: 2, 128>}]} {
    %c0 = arith.constant 0 : index
    %c0_0 = arith.constant 0 : index
    %c0_1 = arith.constant 0 : index
    %0 = vector.load %arg1[%c0, %c0_0, %c0_1] : memref<2x128x128xbf16, #tpu.memory_space<vmem>>, vector<2x128x128xbf16>
    %1 = vector.shape_cast %0 : vector<2x128x128xbf16> to vector<256x128xbf16>
    %c0_2 = arith.constant 0 : index
    %c0_3 = arith.constant 0 : index
    %2 = vector.load %arg3[%c0_2, %c0_3] : memref<128x256xbf16, #tpu.memory_space<vmem>>, vector<128x256xbf16>
    %cst = arith.constant dense<0.000000e+00> : vector<256x256xf32>
    %3 = tpu.matmul %1, %2, %cst {dimension_numbers = #tpu.dot_dimension_numbers<[1], [0], [0], [1], [0, 0, 1, 1], [], []>} : vector<256x128xbf16>, vector<128x256xbf16>, vector<256x256xf32> -> vector<256x256xf32>
    %c0_4 = arith.constant 0 : index
    %c0_5 = arith.constant 0 : index
    %4 = vector.load %arg4[%c0_4, %c0_5] : memref<1x256xf32, #tpu.memory_space<vmem>>, vector<1x256xf32>
    %5 = vector.broadcast %4 : vector<1x256xf32> to vector<256x256xf32>
    %6 = arith.addf %3, %5 : vector<256x256xf32>
    %7 = vector.extract_strided_slice %6 {offsets = [0, 0], sizes = [256, 128], strides = [1, 1]} : vector<256x256xf32> to vector<256x128xf32>
    %8 = vector.extract_strided_slice %6 {offsets = [0, 128], sizes = [256, 128], strides = [1, 1]} : vector<256x256xf32> to vector<256x128xf32>
    %9 = math.tanh %7 : vector<256x128xf32>
    %cst_6 = arith.constant 5.000000e-01 : f32
    %10 = vector.broadcast %cst_6 : f32 to vector<256x128xf32>
    %11 = arith.mulf %10, %8 : vector<256x128xf32>
    %12 = math.tanh %11 : vector<256x128xf32>
    %cst_7 = arith.constant 5.000000e-01 : f32
    %13 = vector.broadcast %cst_7 : f32 to vector<256x128xf32>
    %14 = arith.mulf %13, %12 : vector<256x128xf32>
    %cst_8 = arith.constant 5.000000e-01 : f32
    %15 = vector.broadcast %cst_8 : f32 to vector<256x128xf32>
    %16 = arith.addf %14, %15 : vector<256x128xf32>
    %17 = arith.mulf %9, %16 : vector<256x128xf32>
    %18 = vector.shape_cast %17 : vector<256x128xf32> to vector<2x128x128xf32>
    %c0_9 = arith.constant 0 : index
    %c0_10 = arith.constant 0 : index
    %19 = vector.load %arg2[%c0_9, %c0_10] : memref<2x128xf32, #tpu.memory_space<vmem>>, vector<2x128xf32>
    %20 = vector.shape_cast %19 : vector<2x128xf32> to vector<2x1x128xf32>
    %21 = vector.broadcast %20 : vector<2x1x128xf32> to vector<2x128x128xf32>
    %22 = arith.mulf %18, %21 : vector<2x128x128xf32>
    %cst_11 = arith.constant dense<0.000000e+00> : vector<2x128xf32>
    %23 = vector.multi_reduction <add>, %22, %cst_11 [2] : vector<2x128x128xf32> to vector<2x128xf32>
    %24 = tpu.iota {dimensions = array<i32: 1>} : vector<2x128xi32>
    %c16_i32 = arith.constant 16 : i32
    %25 = vector.broadcast %c16_i32 : i32 to vector<2x128xi32>
    %26 = arith.cmpi slt, %24, %25 : vector<2x128xi32>
    %cst_12 = arith.constant -1.000000e+30 : f32
    %27 = vector.broadcast %cst_12 : f32 to vector<2x128xf32>
    %28 = arith.select %26, %23, %27 : vector<2x128xi1>, vector<2x128xf32>
    %cst_13 = arith.constant dense<0xFF800000> : vector<2xf32>
    %29 = vector.multi_reduction <maximumf>, %28, %cst_13 [1] : vector<2x128xf32> to vector<2xf32>
    %30 = vector.shape_cast %29 : vector<2xf32> to vector<2x1xf32>
    %31 = vector.broadcast %30 : vector<2x1xf32> to vector<2x128xf32>
    %32 = arith.subf %28, %31 : vector<2x128xf32>
    %33 = math.exp %32 : vector<2x128xf32>
    %cst_14 = arith.constant dense<0.000000e+00> : vector<2xf32>
    %34 = vector.multi_reduction <add>, %33, %cst_14 [1] : vector<2x128xf32> to vector<2xf32>
    %35 = vector.shape_cast %34 : vector<2xf32> to vector<2x1xf32>
    %cst_15 = arith.constant 1.000000e+00 : f32
    %36 = vector.broadcast %cst_15 : f32 to vector<2x1xf32>
    %37 = arith.divf %36, %35 : vector<2x1xf32>
    %38 = vector.broadcast %37 : vector<2x1xf32> to vector<2x128xf32>
    %39 = arith.mulf %33, %38 : vector<2x128xf32>
    %c0_16 = arith.constant 0 : index
    %c0_17 = arith.constant 0 : index
    %40 = vector.load %arg5[%c0_16, %c0_17] : memref<2x128xf32, #tpu.memory_space<vmem>>, vector<2x128xf32>
    tpu.vector_store %arg5[%c0_16, %c0_17], %39 {strides = array<i32>} : memref<2x128xf32, #tpu.memory_space<vmem>>, vector<2x128xf32>,
    return
  }
  func.func @transform_0(%arg0: i32) -> (i32, i32, i32) {
    %c0_i32 = arith.constant 0 : i32
    %c0_i32_0 = arith.constant 0 : i32
    %c0_i32_1 = arith.constant 0 : i32
    return %arg0, %c0_i32, %c0_i32_0 : i32, i32, i32
  }
  func.func @transform_1(%arg0: i32) -> (i32, i32) {
    %c0_i32 = arith.constant 0 : i32
    %c0_i32_0 = arith.constant 0 : i32
    return %arg0, %c0_i32 : i32, i32
  }
  func.func @transform_2(%arg0: i32) -> (i32, i32) {
    %c0_i32 = arith.constant 0 : i32
    %c0_i32_0 = arith.constant 0 : i32
    %c0_i32_1 = arith.constant 0 : i32
    return %c0_i32, %c0_i32_0 : i32, i32
  }
  func.func @transform_3(%arg0: i32) -> (i32, i32) {
    %c0_i32 = arith.constant 0 : i32
    %c0_i32_0 = arith.constant 0 : i32
    %c0_i32_1 = arith.constant 0 : i32
    return %c0_i32, %c0_i32_0 : i32, i32
  }
  func.func @transform_4(%arg0: i32) -> (i32, i32) {
    %c0_i32 = arith.constant 0 : i32
    %c0_i32_0 = arith.constant 0 : i32
    return %arg0, %c0_i32 : i32, i32
  }
}

</mosaic_0001>

<bundles_post_ra>
// kernel: tpu_custom_call.1
= control target key start
LH: loop header
LB: loop body
LE: loop exit
PB: predicated region body
PF: predicated region fallthrough
CT: control target
= control target key end

     0   :  { %9 = vsyncpa [#allocation3], 0  ;;  %s1804_s0 = inlined_call_operand.hbm [shape: bf16[2,128,128], index: 0, kind: input, shape index: {}]   ;;  %s1805_s1 = inlined_call_operand.hbm [shape: f32[2,128], index: 1, kind: input, shape index: {}]   ;;  %s1806_s2 = inlined_call_operand.hbm [shape: bf16[128,256], index: 2, kind: input, shape index: {}]   ;;  %s1807_s3 = inlined_call_operand.vmem [shape: f32[1,256], index: 3, kind: input, shape index: {}]   ;;  %s1808_s4 = inlined_call_operand.hbm [shape: f32[2,128], index: 4, kind: output, shape index: {}]  }
   0x1   :  { %10 = vsyncpa [#allocation6], 0 }
   0x2   :  { %11 = vsyncpa [#allocation4], 0  ;;  %s1383_s15 = smov [#allocation5]   ;;  %s1384_s17 = smov [#allocation2]  }
   0x3   :  { %s30_s16 = sshll.u32 %s1383_s15, 4  ;;  %s17_s18 = sshll.u32 %s1384_s17, 4  ;;  %s31_s16 = int_to_ptr.vmem [resolvable:$true] %s30_s16  ;;  %s18_s18 = int_to_ptr.vmem [resolvable:$true] %s17_s18 }
   0x4   :  { %s1305_s19 = scalar_lea.vmem %s31_s16, 32  ;;  %p1310_p1 = scmp.lt.s32.totalorder %s31_s16, %s31_s16 }
   0x5   :  { %p1306_p0 = scmp.ne.s32.totalorder %s31_s16, %s1305_s19  ;;  %p1311_p2 = scmp.lt.s32.totalorder %s1305_s19, %s1305_s19 }
   0x7   :  { %p1312_p3 = por %p1311_p2, %p1310_p1 }
   0x9   :  { %p1313_p4 = pnand %p1312_p3, %p1306_p0 }
   0xb   :  { %1316 = shalt.err (!%p1313_p4)
}
   0xc   :  { %33 = dma.hbm_to_vmem [thread:$0]  %s1805_s1, 32, %s31_s16, [#allocation6]  }
   0xd   :  { %s1325_s22 = scalar_lea.vmem %s18_s18, 2048  ;;  %p1330_p6 = scmp.lt.s32.totalorder %s18_s18, %s18_s18 }
   0xe   :  { %p1326_p5 = scmp.ne.s32.totalorder %s18_s18, %s1325_s22  ;;  %p1331_p7 = scmp.lt.s32.totalorder %s1325_s22, %s1325_s22 }
  0x10   :  { %p1332_p8 = por %p1331_p7, %p1330_p6 }
  0x12   :  { %p1333_p9 = pnand %p1332_p8, %p1326_p5 }
  0x14   :  { %1336 = shalt.err (!%p1333_p9)
}
  0x15   :  { %s1385_s23 = smov 64   ;;  %s1386_s24 = smov 4  }
  0x16   :  { %23 = dma.hbm_to_vmem [thread:$0]  %s1804_s0, 2048, %s18_s18, [#allocation3], %s1385_s23, %s1385_s23, %s1386_s24  }
  0x17   :  { %s1387_s27 = smov [#allocation7]  }
  0x18   :  { %s39_s28 = sshll.u32 %s1387_s27, 4  ;;  %s40_s28 = int_to_ptr.vmem [resolvable:$true] %s39_s28 }
  0x19   :  { %s1345_s29 = scalar_lea.vmem %s40_s28, 2048  ;;  %p1350_p11 = scmp.lt.s32.totalorder %s40_s28, %s40_s28 }
  0x1a   :  { %p1346_p10 = scmp.ne.s32.totalorder %s40_s28, %s1345_s29  ;;  %p1351_p12 = scmp.lt.s32.totalorder %s1345_s29, %s1345_s29 }
  0x1c   :  { %p1352_p13 = por %p1351_p12, %p1350_p11 }
  0x1e   :  { %p1353_p0 = pnand %p1352_p13, %p1346_p10 }
  0x20   :  { %1356 = shalt.err (!%p1353_p0)
}
  0x21   :  { %s1388_s1 = smov 128   ;;  %s1389_s30 = smov 8  }
  0x22   :  { %45 = dma.hbm_to_vmem [thread:$0]  %s1806_s2, 2048, %s40_s28, [#allocation6], %s1388_s1, %s1388_s1, %s1389_s30  }
  0x23   :  { %1377 = dma.done.wait [#allocation3], 2048  }
  0x24   :  { %1378 = vsyncadd [#allocation3], 4294965248 }
  0x25   :  { %1379 = dma.done.wait [#allocation6], 2080  }
  0x26   :  { %1380 = vsyncadd [#allocation6], 4294965216  ;;  %v1390_v0 = vmov 0   ;;  %v1125_v1 = vld [vmem:[#allocation7 + $0x74] ss:$8 sps:$4 sm:$0xff]   ;;  %v1151_v19 = vld [vmem:[#allocation2 + $0x8] sm:$0xff]   ;;  %v108_v33 = vlaneseq }
  0x27   :  { %326 = vmatprep.mubr.bf16.mxu0 %v1390_v0  ;;  %406 = vmatprep.mubr.bf16.mxu1 %v1390_v0  ;;  %v1127_v2 = vld [vmem:[#allocation7 + $0x70] ss:$8 sps:$4 sm:$0xff]   ;;  %v1128_v3 = vld [vmem:[#allocation7 + $0x64] ss:$8 sps:$4 sm:$0xff]   ;;  %v1130_v4 = vld [vmem:[#allocation7 + $0x60] ss:$8 sps:$4 sm:$0xff]  }
  0x28   :  { %294 = vmatprep.subr.bf16.mxu0 %v1125_v1  ;;  %1099 = vmatprep.subr.bf16.mxu1 %v1125_v1  ;;  %v1131_v5 = vld [vmem:[#allocation7 + $0x54] ss:$8 sps:$4 sm:$0xff]   ;;  %v1133_v6 = vld [vmem:[#allocation7 + $0x50] ss:$8 sps:$4 sm:$0xff]   ;;  %v1134_v7 = vld [vmem:[#allocation7 + $0x44] ss:$8 sps:$4 sm:$0xff]  }
  0x29   :  { %295 = vmatpush1.bf16.msra.mxu0 %v1127_v2  ;;  %1107 = vmatpush1.bf16.msra.mxu1 %v1127_v2  ;;  %v1136_v8 = vld [vmem:[#allocation7 + $0x40] ss:$8 sps:$4 sm:$0xff]   ;;  %v1137_v9 = vld [vmem:[#allocation7 + $0x34] ss:$8 sps:$4 sm:$0xff]   ;;  %v1139_v10 = vld [vmem:[#allocation7 + $0x30] ss:$8 sps:$4 sm:$0xff]  }
  0x2a   :  { %296 = vmatprep.subr.bf16.mxu0 %v1128_v3  ;;  %1100 = vmatprep.subr.bf16.mxu1 %v1128_v3  ;;  %v1140_v11 = vld [vmem:[#allocation7 + $0x24] ss:$8 sps:$4 sm:$0xff]   ;;  %v1142_v12 = vld [vmem:[#allocation7 + $0x20] ss:$8 sps:$4 sm:$0xff]   ;;  %v1143_v13 = vld [vmem:[#allocation7 + $0x14] ss:$8 sps:$4 sm:$0xff]  }
  0x2b   :  { %v1145_v14 = vld [vmem:[#allocation7 + $0x10] ss:$8 sps:$4 sm:$0xff]   ;;  %v1146_v15 = vld [vmem:[#allocation7 + $0x4] ss:$8 sps:$4 sm:$0xff]   ;;  %v1148_v16 = vld [vmem:[#allocation7] ss:$8 sps:$4 sm:$0xff]  }
  0x2c   :  { %v1149_v17 = vld [vmem:[#allocation2] sm:$0xff]   ;;  %v1152_v20 = vld [vmem:[#allocation2 + $0x48] sm:$0xff]   ;;  %v1153_v21 = vld [vmem:[#allocation2 + $0x10] sm:$0xff]   ;;  %v1444_v34 = vshrl.u32 %v108_v33, 7  ;;  %v1391_v58 = vmov 1966171168  }
  0x2d   :  { %297 = vmatpush1.bf16.msra.mxu0 %v1130_v4  ;;  %1108 = vmatpush1.bf16.msra.mxu1 %v1130_v4  ;;  %v1150_v18 = vld [vmem:[#allocation2 + $0x40] sm:$0xff]   ;;  %v1154_v22 = vld [vmem:[#allocation2 + $0x50] sm:$0xff]   ;;  %v1155_v23 = vld [vmem:[#allocation2 + $0x18] sm:$0xff]   ;;  %v690_v59 = vunpack.c.l.s4 %v1391_v58  ;;  %vm853_vm0 = vcmask 130112   ;;  %vm860_vm1 = vcmask 195712   ;;  %vm867_vm2 = vcmask 261312  }
  0x2e   :  { %298 = vmatprep.subr.bf16.mxu0 %v1131_v5  ;;  %1101 = vmatprep.subr.bf16.mxu1 %v1131_v5  ;;  %v1156_v24 = vld [vmem:[#allocation2 + $0x58] sm:$0xff]   ;;  %v1157_v25 = vld [vmem:[#allocation2 + $0x20] sm:$0xff]   ;;  %v1159_v27 = vld [vmem:[#allocation2 + $0x28] sm:$0xff]   ;;  %v1447_v35 = vsub.s32 0, %v1444_v34  ;;  %v114_v37 = vsub.s32 1, %v1444_v34  ;;  %vm874_vm3 = vcmask 326912  }
  0x2f   :  { %v1158_v26 = vld [vmem:[#allocation2 + $0x60] sm:$0xff]   ;;  %v1160_v28 = vld [vmem:[#allocation2 + $0x68] sm:$0xff]   ;;  %v1161_v29 = vld [vmem:[#allocation2 + $0x30] sm:$0xff]   ;;  %vm881_vm4 = vcmask 392512   ;;  %vm888_vm5 = vcmask 458112   ;;  %vm895_vm6 = vcmask 523712  }
  0x30   :  { %v1162_v30 = vld [vmem:[#allocation2 + $0x70] sm:$0xff]   ;;  %v1163_v31 = vld [vmem:[#allocation2 + $0x38] sm:$0xff]   ;;  %v106_v36 = vld [vmem:[%s1807_s3] sm:$0x3]  ;;  %vm902_vm7 = vcmask 589312   ;;  %vm909_vm8 = vcmask 654912  }
  0x31   :  { %299 = vmatpush1.bf16.msra.mxu0 %v1133_v6  ;;  %1109 = vmatpush1.bf16.msra.mxu1 %v1133_v6  ;;  %v1164_v32 = vld [vmem:[#allocation2 + $0x78] sm:$0xff]   ;;  %v1454_v38 = vrot.slane %v106_v36, %v1447_v35  ;;  %v1456_v39 = vrot.slane %v106_v36, %v114_v37  ;;  %v1470_v6 = vld.sshfl [vmem:[#allocation5] sm:$0x11 pattern:$0x75316420]  ;;  %vm916_vm9 = vcmask 720512  }
  0x32   :  { %300 = vmatprep.subr.bf16.mxu0 %v1134_v7  ;;  %1102 = vmatprep.subr.bf16.mxu1 %v1134_v7  ;;  %v691_v7 = vunpack.c.0.s8 %v690_v59  ;;  %vm923_vm10 = vcmask 786112   ;;  %vm930_vm11 = vcmask 851712   ;;  %vm937_vm12 = vcmask 917312   ;;  %s1392_s3 = smov [#allocation8]  }
  0x33   :  { %vm944_vm13 = vcmask 982912   ;;  %vm951_vm14 = vcmask 1048512   ;;  %vm1032_vm15 = vcmask 1041409   ;;  %s1056_s7 = sshll.u32 %s1392_s3, 4  ;;  %s1057_s7 = int_to_ptr.vmem [resolvable:$true] %s1056_s7 }
  0x34   :  { %s1357_s8 = scalar_lea.vmem %s1057_s7, 32  ;;  %p1362_p2 = scmp.lt.s32.totalorder %s1057_s7, %s1057_s7 }
  0x35   :  { %301 = vmatpush1.bf16.msra.mxu0 %v1136_v8  ;;  %1110 = vmatpush1.bf16.msra.mxu1 %v1136_v8  ;;  %p1358_p1 = scmp.ne.s32.totalorder %s1057_s7, %s1357_s8  ;;  %p1363_p3 = scmp.lt.s32.totalorder %s1357_s8, %s1357_s8 }
  0x36   :  { %302 = vmatprep.subr.bf16.mxu0 %v1137_v9  ;;  %1103 = vmatprep.subr.bf16.mxu1 %v1137_v9 }
  0x37   :  { %p1364_p4 = por %p1363_p3, %p1362_p2 }
  0x39   :  { %303 = vmatpush1.bf16.msra.mxu0 %v1139_v10  ;;  %1111 = vmatpush1.bf16.msra.mxu1 %v1139_v10  ;;  %p1365_p5 = pnand %p1364_p4, %p1358_p1 }
  0x3a   :  { %304 = vmatprep.subr.bf16.mxu0 %v1140_v11  ;;  %1104 = vmatprep.subr.bf16.mxu1 %v1140_v11 }
  0x3d   :  { %305 = vmatpush1.bf16.msra.mxu0 %v1142_v12  ;;  %1112 = vmatpush1.bf16.msra.mxu1 %v1142_v12 }
  0x3e   :  { %306 = vmatprep.subr.bf16.mxu0 %v1143_v13  ;;  %1105 = vmatprep.subr.bf16.mxu1 %v1143_v13 }
  0x41   :  { %307 = vmatpush1.bf16.msra.mxu0 %v1145_v14  ;;  %1113 = vmatpush1.bf16.msra.mxu1 %v1145_v14 }
  0x42   :  { %308 = vmatprep.subr.bf16.mxu0 %v1146_v15  ;;  %1106 = vmatprep.subr.bf16.mxu1 %v1146_v15 }
  0x45   :  { %309 = vmatpush1.bf16.msra.mxu0 %v1148_v16  ;;  %1114 = vmatpush1.bf16.msra.mxu1 %v1148_v16  ;;  %v688_v16 = vcombine.high %v1470_v6, %v1470_v6 }
  0x48   :  { %327 = vmatmul.mubr.bf16.vlgmr.msra.gmra.mxu0 %v1149_v17  ;;  %407 = vmatmul.mubr.bf16.vlgmr.msra.gmra.mxu1 %v1150_v18 }
  0x49   :  { %336 = vmatprep.mubr.bf16.mxu0 %v1390_v0  ;;  %416 = vmatprep.mubr.bf16.mxu1 %v1390_v0 }
  0x50   :  { %337 = vmatmul.mubr.bf16.gmra.mxu0 %v1151_v19  ;;  %417 = vmatmul.mubr.bf16.gmra.mxu1 %v1152_v20  ;;  %v694_v19 = vsub.s32 %v691_v7, %v1444_v34 }
  0x51   :  { %346 = vmatprep.mubr.bf16.mxu0 %v1390_v0  ;;  %426 = vmatprep.mubr.bf16.mxu1 %v1390_v0 }
  0x58   :  { %347 = vmatmul.mubr.bf16.gmra.mxu0 %v1153_v21  ;;  %427 = vmatmul.mubr.bf16.gmra.mxu1 %v1154_v22 }
  0x59   :  { %356 = vmatprep.mubr.bf16.mxu0 %v1390_v0  ;;  %436 = vmatprep.mubr.bf16.mxu1 %v1390_v0 }
  0x60   :  { %357 = vmatmul.mubr.bf16.gmra.mxu0 %v1155_v23  ;;  %437 = vmatmul.mubr.bf16.gmra.mxu1 %v1156_v24 }
  0x61   :  { %366 = vmatprep.mubr.bf16.mxu0 %v1390_v0  ;;  %446 = vmatprep.mubr.bf16.mxu1 %v1390_v0 }
  0x68   :  { %367 = vmatmul.mubr.bf16.gmra.mxu0 %v1157_v25  ;;  %447 = vmatmul.mubr.bf16.gmra.mxu1 %v1158_v26 }
  0x69   :  { %376 = vmatprep.mubr.bf16.mxu0 %v1390_v0  ;;  %456 = vmatprep.mubr.bf16.mxu1 %v1390_v0 }
  0x70   :  { %377 = vmatmul.mubr.bf16.gmra.mxu0 %v1159_v27  ;;  %457 = vmatmul.mubr.bf16.gmra.mxu1 %v1160_v28 }
  0x71   :  { %386 = vmatprep.mubr.bf16.mxu0 %v1390_v0  ;;  %466 = vmatprep.mubr.bf16.mxu1 %v1390_v0 }
  0x78   :  { %387 = vmatmul.mubr.bf16.gmra.mxu0 %v1161_v29  ;;  %467 = vmatmul.mubr.bf16.gmra.mxu1 %v1162_v30 }
  0x79   :  { %396 = vmatprep.mubr.bf16.mxu0 %v1390_v0  ;;  %476 = vmatprep.mubr.bf16.mxu1 %v1390_v0 }
  0x80   :  { %397 = vmatmul.mubr.bf16.gmra.mxu0 %v1163_v31  ;;  %477 = vmatmul.mubr.bf16.gmra.mxu1 %v1164_v32  ;;  %v702_v32 = vrot.slane %v688_v16, %v694_v19 }
 0x108   :  { %v328_v40 = vpop.f32.mrf.mxu0  ;;  %v408_v41 = vpop.f32.mrf.mxu1 }
 0x109   :  { %v329_v42 = vadd.f32 %v328_v40, %v1454_v38  ;;  %v409_v43 = vadd.f32 %v408_v41, %v1454_v38  ;;  %v695_v41 = vrot.slane %v1470_v6, %v694_v19 }
 0x10a   :  { %v330_v44 = vpop.f32.mrf.mxu0  ;;  %v410_v45 = vpop.f32.mrf.mxu1 }
 0x10b   :  { %v331_v46 = vadd.f32 %v330_v44, %v1456_v39  ;;  %v411_v47 = vadd.f32 %v410_v45, %v1456_v39  ;;  %1165 = vtanh.f32 %v329_v42 }
 0x10c   :  { %v332_v48 = vpop.f32.mrf.mxu0  ;;  %v412_v49 = vpop.f32.mrf.mxu1  ;;  %1167 = vtanh.f32 %v409_v43 }
 0x10d   :  { %v519_v50 = vmul.f32 0.5, %v331_v46  ;;  %v535_v51 = vmul.f32 0.5, %v411_v47  ;;  %v333_v52 = vadd.f32 %v332_v48, %v1454_v38  ;;  %v413_v53 = vadd.f32 %v412_v49, %v1454_v38 }
 0x10e   :  { %v334_v54 = vpop.f32.mrf.mxu0  ;;  %v414_v55 = vpop.f32.mrf.mxu1 }
 0x10f   :  { %1169 = vtanh.f32 %v519_v50  ;;  %v335_v56 = vadd.f32 %v334_v54, %v1456_v39  ;;  %v415_v57 = vadd.f32 %v414_v55, %v1456_v39  ;;  %v1491_v55 = vrot.slane %v702_v32, %v1447_v35 }
 0x110   :  { %1171 = vtanh.f32 %v535_v51  ;;  %v338_v60 = vpop.f32.mrf.mxu0  ;;  %v418_v61 = vpop.f32.mrf.mxu1 }
 0x111   :  { %1173 = vtanh.f32 %v333_v52  ;;  %v520_v62 = vmul.f32 0.5, %v335_v56  ;;  %v536_v63 = vmul.f32 0.5, %v415_v57  ;;  %v339_v0 = vadd.f32 %v338_v60, %v1454_v38 }
 0x112   :  { %1175 = vtanh.f32 %v413_v53  ;;  %v419_v1 = vadd.f32 %v418_v61, %v1454_v38  ;;  %v340_v2 = vpop.f32.mrf.mxu0  ;;  %v420_v3 = vpop.f32.mrf.mxu1  ;;  %v1494_v61 = vrot.slane %v695_v41, %v1447_v35 }
 0x113   :  { %1177 = vtanh.f32 %v520_v62  ;;  %v341_v4 = vadd.f32 %v340_v2, %v1456_v39  ;;  %v421_v5 = vadd.f32 %v420_v3, %v1456_v39 }
 0x114   :  { %1179 = vtanh.f32 %v536_v63  ;;  %v342_v8 = vpop.f32.mrf.mxu0  ;;  %v422_v9 = vpop.f32.mrf.mxu1 }
 0x115   :  { %1181 = vtanh.f32 %v339_v0  ;;  %v521_v10 = vmul.f32 0.5, %v341_v4  ;;  %v537_v11 = vmul.f32 0.5, %v421_v5  ;;  %v343_v12 = vadd.f32 %v342_v8, %v1454_v38 }
 0x116   :  { %1183 = vtanh.f32 %v419_v1  ;;  %v423_v13 = vadd.f32 %v422_v9, %v1454_v38  ;;  %v344_v14 = vpop.f32.mrf.mxu0  ;;  %v424_v15 = vpop.f32.mrf.mxu1 }
 0x117   :  { %1185 = vtanh.f32 %v521_v10  ;;  %v345_v17 = vadd.f32 %v344_v14, %v1456_v39  ;;  %v425_v18 = vadd.f32 %v424_v15, %v1456_v39 }
 0x118   :  { %1187 = vtanh.f32 %v537_v11  ;;  %v348_v20 = vpop.f32.mrf.mxu0  ;;  %v428_v21 = vpop.f32.mrf.mxu1 }
 0x119   :  { %1189 = vtanh.f32 %v343_v12  ;;  %v522_v22 = vmul.f32 0.5, %v345_v17  ;;  %v538_v23 = vmul.f32 0.5, %v425_v18  ;;  %v349_v24 = vadd.f32 %v348_v20, %v1454_v38  ;;  %v1166_v25 = vpop.eup %1165 }
 0x11a   :  { %1191 = vtanh.f32 %v423_v13  ;;  %v429_v26 = vadd.f32 %v428_v21, %v1454_v38  ;;  %v350_v27 = vpop.f32.mrf.mxu0  ;;  %v430_v28 = vpop.f32.mrf.mxu1 }
 0x11b   :  { %v1168_v29 = vpop.eup %1167  ;;  %1193 = vtanh.f32 %v522_v22  ;;  %v351_v30 = vadd.f32 %v350_v27, %v1456_v39  ;;  %v431_v31 = vadd.f32 %v430_v28, %v1456_v39 }
 0x11c   :  { %v1170_v36 = vpop.eup %1169  ;;  %1195 = vtanh.f32 %v538_v23  ;;  %v352_v37 = vpop.f32.mrf.mxu0 }
 0x11d   :  { %v432_v40 = vpop.f32.mrf.mxu1  ;;  %v1172_v42 = vpop.eup %1171  ;;  %1197 = vtanh.f32 %v349_v24  ;;  %v523_v43 = vmul.f32 0.5, %v351_v30  ;;  %v539_v44 = vmul.f32 0.5, %v431_v31  ;;  %v353_v45 = vadd.f32 %v352_v37, %v1454_v38 }
 0x11e   :  { %v1485_v46 = vpop.eup %1173  ;;  %1199 = vtanh.f32 %v429_v26  ;;  %v433_v47 = vadd.f32 %v432_v40, %v1454_v38  ;;  %v354_v48 = vpop.f32.mrf.mxu0  ;;  %v599_v50 = vmul.f32 0.5, %v1172_v42  ;;  %v583_v51 = vmul.f32 0.5, %v1170_v36 }
 0x11f   :  { %v434_v49 = vpop.f32.mrf.mxu1  ;;  %v1176_v52 = vpop.eup %1175  ;;  %1201 = vtanh.f32 %v523_v43  ;;  %v355_v53 = vadd.f32 %v354_v48, %v1456_v39 }
 0x120   :  { %v435_v54 = vadd.f32 %v434_v49, %v1456_v39  ;;  %v1178_v56 = vpop.eup %1177  ;;  %1203 = vtanh.f32 %v539_v44  ;;  %v358_v57 = vpop.f32.mrf.mxu0  ;;  %v631_v59 = vadd.f32 0.5, %v599_v50  ;;  %v615_v60 = vadd.f32 0.5, %v583_v51 }
 0x121   :  { %v438_v58 = vpop.f32.mrf.mxu1  ;;  %v1180_v62 = vpop.eup %1179  ;;  %v584_v63 = vmul.f32 0.5, %v1178_v56  ;;  %1205 = vtanh.f32 %v353_v45  ;;  %v524_v0 = vmul.f32 0.5, %v355_v53  ;;  %v359_v4 = vadd.f32 %v358_v57, %v1454_v38 }
 0x122   :  { %v540_v1 = vmul.f32 0.5, %v435_v54  ;;  %v1496_v2 = vpop.eup %1181  ;;  %v600_v3 = vmul.f32 0.5, %v1180_v62  ;;  %1207 = vtanh.f32 %v433_v47  ;;  %v439_v5 = vadd.f32 %v438_v58, %v1454_v38  ;;  %v360_v6 = vpop.f32.mrf.mxu0 }
 0x123   :  { %v440_v7 = vpop.f32.mrf.mxu1  ;;  %v1500_v8 = vpop.eup %1183  ;;  %1209 = vtanh.f32 %v524_v0  ;;  %v361_v35 = vadd.f32 %v360_v6, %v1456_v39  ;;  %v663_v10 = vmul.f32 %v1168_v29, %v631_v59  ;;  %v647_v14 = vmul.f32 %v1166_v25, %v615_v60 }
 0x124   :  { %v441_v9 = vadd.f32 %v440_v7, %v1456_v39  ;;  %v1186_v11 = vpop.eup %1185  ;;  %1211 = vtanh.f32 %v540_v1  ;;  %v362_v12 = vpop.f32.mrf.mxu0  ;;  %v632_v15 = vadd.f32 0.5, %v600_v3  ;;  %v616_v16 = vadd.f32 0.5, %v584_v63 }
 0x125   :  { %v442_v13 = vpop.f32.mrf.mxu1  ;;  %v1188_v17 = vpop.eup %1187  ;;  %v585_v18 = vmul.f32 0.5, %v1186_v11  ;;  %1213 = vtanh.f32 %v359_v4  ;;  %v525_v19 = vmul.f32 0.5, %v361_v35  ;;  %v363_v23 = vadd.f32 %v362_v12, %v1454_v38 }
 0x126   :  { %v541_v20 = vmul.f32 0.5, %v441_v9  ;;  %v1504_v21 = vpop.eup %1189  ;;  %v601_v22 = vmul.f32 0.5, %v1188_v17  ;;  %1215 = vtanh.f32 %v439_v5  ;;  %v443_v24 = vadd.f32 %v442_v13, %v1454_v38  ;;  %v364_v26 = vpop.f32.mrf.mxu0 }
 0x127   :  { %v444_v27 = vpop.f32.mrf.mxu1  ;;  %v1508_v28 = vpop.eup %1191  ;;  %1217 = vtanh.f32 %v525_v19  ;;  %v729_v25 = vmul.f32 %v1491_v55, %v663_v10  ;;  %v713_v29 = vmul.f32 %v1494_v61, %v647_v14  ;;  %v365_v30 = vadd.f32 %v364_v26, %v1456_v39 }
 0x128   :  { %v1194_v31 = vpop.eup %1193  ;;  %1219 = vtanh.f32 %v541_v20  ;;  %v445_v32 = vadd.f32 %v444_v27, %v1456_v39  ;;  %v368_v36 = vpop.f32.mrf.mxu0  ;;  %v664_v40 = vmul.f32 %v1176_v52, %v632_v15  ;;  %v648_v41 = vmul.f32 %v1485_v46, %v616_v16 }
 0x129   :  { %v448_v37 = vpop.f32.mrf.mxu1  ;;  %v1196_v42 = vpop.eup %1195  ;;  %v586_v43 = vmul.f32 0.5, %v1194_v31  ;;  %1221 = vtanh.f32 %v363_v23  ;;  %777 = vadd.xlane.f32.xlu1 %v729_v25  ;;  %745 = vadd.xlane.f32.xlu0 %v713_v29  ;;  %v526_v44 = vmul.f32 0.5, %v365_v30  ;;  %v369_v45 = vadd.f32 %v368_v36, %v1454_v38 }
 0x12a   :  { %v1516_v47 = vpop.eup %1197  ;;  %v602_v48 = vmul.f32 0.5, %v1196_v42  ;;  %1223 = vtanh.f32 %v443_v24  ;;  %v542_v49 = vmul.f32 0.5, %v445_v32  ;;  %v449_v50 = vadd.f32 %v448_v37, %v1454_v38  ;;  %v370_v51 = vpop.f32.mrf.mxu0 }
 0x12b   :  { %v450_v53 = vpop.f32.mrf.mxu1  ;;  %v1519_v52 = vpop.eup %1199  ;;  %1225 = vtanh.f32 %v526_v44  ;;  %v730_v46 = vmul.f32 %v1491_v55, %v664_v40  ;;  %v714_v54 = vmul.f32 %v1494_v61, %v648_v41  ;;  %v371_v56 = vadd.f32 %v370_v51, %v1456_v39 }
 0x12c   :  { %v1202_v57 = vpop.eup %1201  ;;  %1227 = vtanh.f32 %v542_v49  ;;  %v451_v58 = vadd.f32 %v450_v53, %v1456_v39  ;;  %v372_v59 = vpop.f32.mrf.mxu0  ;;  %v633_v62 = vadd.f32 0.5, %v601_v22  ;;  %v617_v63 = vadd.f32 0.5, %v585_v18 }
 0x12d   :  { %v452_v60 = vpop.f32.mrf.mxu1  ;;  %v1204_v0 = vpop.eup %1203  ;;  %1229 = vtanh.f32 %v369_v45  ;;  %779 = vadd.xlane.f32.xlu1 %v730_v46  ;;  %747 = vadd.xlane.f32.xlu0 %v714_v54  ;;  %v527_v1 = vmul.f32 0.5, %v371_v56  ;;  %v373_v3 = vadd.f32 %v372_v59, %v1454_v38  ;;  %v634_v18 = vadd.f32 0.5, %v602_v48 }
 0x12e   :  { %v1526_v4 = vpop.eup %1205  ;;  %v603_v5 = vmul.f32 0.5, %v1204_v0  ;;  %1231 = vtanh.f32 %v449_v50  ;;  %v543_v6 = vmul.f32 0.5, %v451_v58  ;;  %v453_v7 = vadd.f32 %v452_v60, %v1454_v38  ;;  %v374_v35 = vpop.f32.mrf.mxu0 }
 0x12f   :  { %v454_v9 = vpop.f32.mrf.mxu1  ;;  %v1529_v10 = vpop.eup %1207  ;;  %1233 = vtanh.f32 %v527_v1  ;;  %v665_v11 = vmul.f32 %v1500_v8, %v633_v62  ;;  %v649_v12 = vmul.f32 %v1496_v2, %v617_v63  ;;  %v375_v13 = vadd.f32 %v374_v35, %v1456_v39 }
 0x130   :  { %v1210_v14 = vpop.eup %1209  ;;  %1235 = vtanh.f32 %v543_v6  ;;  %v455_v15 = vadd.f32 %v454_v9, %v1456_v39  ;;  %v378_v16 = vpop.f32.mrf.mxu0  ;;  %v618_v19 = vadd.f32 0.5, %v586_v43  ;;  %v587_v8 = vmul.f32 0.5, %v1202_v57 }
 0x131   :  { %v458_v17 = vpop.f32.mrf.mxu1  ;;  %v1212_v20 = vpop.eup %1211  ;;  %1237 = vtanh.f32 %v373_v3  ;;  %v731_v22 = vmul.f32 %v1491_v55, %v665_v11  ;;  %v715_v23 = vmul.f32 %v1494_v61, %v649_v12  ;;  %v528_v2 = vmul.f32 0.5, %v375_v13 }
 0x132   :  { %v1537_v24 = vpop.eup %1213  ;;  %1239 = vtanh.f32 %v453_v7  ;;  %v544_v26 = vmul.f32 0.5, %v455_v15  ;;  %v380_v27 = vpop.f32.mrf.mxu0  ;;  %v379_v30 = vadd.f32 %v378_v16, %v1454_v38  ;;  %v459_v31 = vadd.f32 %v458_v17, %v1454_v38 }
 0x133   :  { %v460_v25 = vpop.f32.mrf.mxu1  ;;  %v1539_v29 = vpop.eup %1215  ;;  %781 = vadd.xlane.f32.xlu1 %v731_v22  ;;  %749 = vadd.xlane.f32.xlu0 %v715_v23  ;;  %v666_v32 = vmul.f32 %v1508_v28, %v634_v18  ;;  %v635_v36 = vadd.f32 0.5, %v603_v5  ;;  %1241 = vtanh.f32 %v528_v2  ;;  %v650_v40 = vmul.f32 %v1504_v21, %v618_v19 }
 0x134   :  { %v1218_v37 = vpop.eup %1217  ;;  %v381_v41 = vadd.f32 %v380_v27, %v1456_v39  ;;  %v461_v42 = vadd.f32 %v460_v25, %v1456_v39  ;;  %v382_v43 = vpop.f32.mrf.mxu0  ;;  %v588_v48 = vmul.f32 0.5, %v1210_v14  ;;  %v604_v49 = vmul.f32 0.5, %v1212_v20 }
 0x135   :  { %v462_v44 = vpop.f32.mrf.mxu1  ;;  %v1220_v45 = vpop.eup %1219  ;;  %1243 = vtanh.f32 %v544_v26  ;;  %v732_v50 = vmul.f32 %v1491_v55, %v666_v32  ;;  %v716_v28 = vmul.f32 %v1494_v61, %v650_v40  ;;  %v383_v21 = vadd.f32 %v382_v43, %v1454_v38 }
 0x136   :  { %v1548_v51 = vpop.eup %1221  ;;  %1245 = vtanh.f32 %v379_v30  ;;  %v529_v53 = vmul.f32 0.5, %v381_v41  ;;  %v384_v46 = vpop.f32.mrf.mxu0  ;;  %v545_v57 = vmul.f32 0.5, %v461_v42  ;;  %v463_v58 = vadd.f32 %v462_v44, %v1454_v38 }
 0x137   :  { %v464_v54 = vpop.f32.mrf.mxu1  ;;  %v1552_v56 = vpop.eup %1223  ;;  %1247 = vtanh.f32 %v459_v31  ;;  %783 = vadd.xlane.f32.xlu1 %v732_v50  ;;  %v667_v59 = vmul.f32 %v1519_v52, %v635_v36  ;;  %751 = vadd.xlane.f32.xlu0 %v716_v28  ;;  %v619_v62 = vadd.f32 0.5, %v587_v8  ;;  %v385_v63 = vadd.f32 %v384_v46, %v1456_v39 }
 0x138   :  { %v1226_v60 = vpop.eup %1225  ;;  %1249 = vtanh.f32 %v529_v53  ;;  %v465_v0 = vadd.f32 %v464_v54, %v1456_v39  ;;  %v388_v1 = vpop.f32.mrf.mxu0  ;;  %v589_v6 = vmul.f32 0.5, %v1218_v37  ;;  %v605_v7 = vmul.f32 0.5, %v1220_v45 }
 0x139   :  { %v468_v3 = vpop.f32.mrf.mxu1  ;;  %v1228_v5 = vpop.eup %1227  ;;  %1251 = vtanh.f32 %v545_v57  ;;  %v733_v35 = vmul.f32 %v1491_v55, %v667_v59  ;;  %v1561_v11 = vmul.f32 0.5, %v1226_v60  ;;  %v651_v52 = vmul.f32 %v1516_v47, %v619_v62 }
 0x13a   :  { %v1559_v9 = vpop.eup %1229  ;;  %1253 = vtanh.f32 %v383_v21  ;;  %v530_v12 = vmul.f32 0.5, %v385_v63  ;;  %v390_v13 = vpop.f32.mrf.mxu0  ;;  %v546_v16 = vmul.f32 0.5, %v465_v0  ;;  %v389_v17 = vadd.f32 %v388_v1, %v1454_v38 }
 0x13b   :  { %v470_v14 = vpop.f32.mrf.mxu1  ;;  %v1564_v15 = vpop.eup %1231  ;;  %1255 = vtanh.f32 %v463_v58  ;;  %785 = vadd.xlane.f32.xlu1 %v733_v35  ;;  %v636_v18 = vadd.f32 0.5, %v604_v49  ;;  %v717_v20 = vmul.f32 %v1494_v61, %v651_v52  ;;  %v620_v22 = vadd.f32 0.5, %v588_v48 }
 0x13c   :  { %v1234_v19 = vpop.eup %1233  ;;  %1257 = vtanh.f32 %v530_v12  ;;  %v391_v23 = vadd.f32 %v390_v13, %v1456_v39  ;;  %v392_v8 = vpop.f32.mrf.mxu0  ;;  %v606_v26 = vmul.f32 0.5, %v1228_v5  ;;  %v471_v25 = vadd.f32 %v470_v14, %v1456_v39 }
 0x13d   :  { %v472_v47 = vpop.f32.mrf.mxu1  ;;  %v1236_v2 = vpop.eup %1235  ;;  %1259 = vtanh.f32 %v546_v16  ;;  %v668_v27 = vmul.f32 %v1529_v10, %v636_v18  ;;  %v1573_v31 = vmul.f32 0.5, %v1234_v19  ;;  %753 = vadd.xlane.f32.xlu0 %v717_v20  ;;  %v469_v32 = vadd.f32 %v468_v3, %v1454_v38 }
 0x13e   :  { %v1571_v30 = vpop.eup %1237  ;;  %v652_v36 = vmul.f32 %v1526_v4, %v620_v22  ;;  %v531_v37 = vmul.f32 0.5, %v391_v23  ;;  %v394_v40 = vpop.f32.mrf.mxu0  ;;  %1261 = vtanh.f32 %v389_v17  ;;  %v547_v10 = vmul.f32 0.5, %v471_v25 }
 0x13f   :  { %v474_v41 = vpop.f32.mrf.mxu1  ;;  %v1577_v42 = vpop.eup %1239  ;;  %v734_v43 = vmul.f32 %v1491_v55, %v668_v27  ;;  %v393_v44 = vadd.f32 %v392_v8, %v1454_v38  ;;  %v473_v48 = vadd.f32 %v472_v47, %v1454_v38  ;;  %v637_v49 = vadd.f32 0.5, %v605_v7 }
 0x140   :  { %v718_v45 = vmul.f32 %v1494_v61, %v652_v36  ;;  %1263 = vtanh.f32 %v531_v37  ;;  %v398_v50 = vpop.f32.mrf.mxu0  ;;  %v1242_v4 = vpop.eup %1241  ;;  %v621_v53 = vadd.f32 0.5, %v589_v6  ;;  %v395_v21 = vadd.f32 %v394_v40, %v1456_v39 }
 0x141   :  { %v478_v28 = vpop.f32.mrf.mxu1  ;;  %787 = vadd.xlane.f32.xlu1 %v734_v43  ;;  %1265 = vtanh.f32 %v547_v10  ;;  %v475_v46 = vadd.f32 %v474_v41, %v1456_v39  ;;  %v607_v57 = vmul.f32 0.5, %v1236_v2  ;;  %v1585_v58 = vmul.f32 0.5, %v1242_v4 }
 0x142   :  { %v1244_v54 = vpop.eup %1243  ;;  %1267 = vtanh.f32 %v469_v32  ;;  %755 = vadd.xlane.f32.xlu0 %v718_v45  ;;  %v669_v59 = vmul.f32 %v1539_v29, %v637_v49  ;;  %v400_v60 = vpop.f32.mrf.mxu0  ;;  %v653_v0 = vmul.f32 %v1537_v24, %v621_v53  ;;  %v532_v1 = vmul.f32 0.5, %v395_v21 }
 0x143   :  { %v480_v62 = vpop.f32.mrf.mxu1  ;;  %v1588_v63 = vpop.eup %1245  ;;  %1269 = vtanh.f32 %v393_v44  ;;  %v399_v3 = vadd.f32 %v398_v50, %v1454_v38  ;;  %v548_v7 = vmul.f32 0.5, %v475_v46  ;;  %v479_v35 = vadd.f32 %v478_v28, %v1454_v38 }
 0x144   :  { %v1592_v5 = vpop.eup %1247  ;;  %1271 = vtanh.f32 %v473_v48  ;;  %v735_v6 = vmul.f32 %v1491_v55, %v669_v59  ;;  %v402_v52 = vpop.f32.mrf.mxu0  ;;  %v719_v13 = vmul.f32 %v1494_v61, %v653_v0  ;;  %v638_v14 = vadd.f32 0.5, %v606_v26 }
 0x145   :  { %v482_v29 = vpop.f32.mrf.mxu1  ;;  %v1250_v12 = vpop.eup %1249  ;;  %1273 = vtanh.f32 %v532_v1  ;;  %v622_v24 = vadd.f32 0.5, %v1561_v11  ;;  %v608_v17 = vmul.f32 0.5, %v1244_v54  ;;  %v401_v18 = vadd.f32 %v400_v60, %v1456_v39 }
 0x146   :  { %v1252_v16 = vpop.eup %1251  ;;  %789 = vadd.xlane.f32.xlu1 %v735_v6  ;;  %1275 = vtanh.f32 %v548_v7  ;;  %v481_v19 = vadd.f32 %v480_v62, %v1456_v39  ;;  %v593_v22 = vmul.f32 0.5, %v1250_v12  ;;  %757 = vadd.xlane.f32.xlu0 %v719_v13  ;;  %v670_v23 = vmul.f32 %v1552_v56, %v638_v14  ;;  %v404_v47 = vpop.f32.mrf.mxu0 }
 0x147   :  { %v1600_v20 = vpop.eup %1253  ;;  %1277 = vtanh.f32 %v399_v3  ;;  %v654_v8 = vmul.f32 %v1548_v51, %v622_v24  ;;  %v484_v2 = vpop.f32.mrf.mxu1  ;;  %v609_v26 = vmul.f32 0.5, %v1252_v16  ;;  %v533_v27 = vmul.f32 0.5, %v401_v18 }
 0x148   :  { %v1256_v11 = vpop.eup %1255  ;;  %1279 = vtanh.f32 %v479_v35  ;;  %v549_v25 = vmul.f32 0.5, %v481_v19  ;;  %v736_v36 = vmul.f32 %v1491_v55, %v670_v23  ;;  %v639_v40 = vadd.f32 0.5, %v607_v57 }
 0x149   :  { %v1258_v32 = vpop.eup %1257  ;;  %v720_v37 = vmul.f32 %v1494_v61, %v654_v8  ;;  %v623_v41 = vadd.f32 0.5, %v1573_v31  ;;  %1281 = vtanh.f32 %v533_v27  ;;  %v403_v56 = vadd.f32 %v402_v52, %v1454_v38 }
 0x14a   :  { %v1260_v43 = vpop.eup %1259  ;;  %v405_v51 = vadd.f32 %v404_v47, %v1456_v39  ;;  %v485_v10 = vadd.f32 %v484_v2, %v1456_v39  ;;  %v594_v44 = vmul.f32 0.5, %v1258_v32  ;;  %791 = vadd.xlane.f32.xlu1 %v736_v36  ;;  %1283 = vtanh.f32 %v549_v25 }
 0x14b   :  { %759 = vadd.xlane.f32.xlu0 %v720_v37  ;;  %v671_v45 = vmul.f32 %v1564_v15, %v639_v40  ;;  %v655_v48 = vmul.f32 %v1559_v9, %v623_v41  ;;  %v1262_v49 = vpop.eup %1261  ;;  %v610_v50 = vmul.f32 0.5, %v1260_v43  ;;  %v640_v4 = vadd.f32 0.5, %v608_v17 }
 0x14c   :  { %v534_v28 = vmul.f32 0.5, %v405_v51  ;;  %v550_v31 = vmul.f32 0.5, %v485_v10  ;;  %v483_v21 = vadd.f32 %v482_v29, %v1454_v38  ;;  %v624_v54 = vadd.f32 0.5, %v1585_v58 }
 0x14d   :  { %v1264_v53 = vpop.eup %1263  ;;  %v737_v46 = vmul.f32 %v1491_v55, %v671_v45  ;;  %v721_v39 = vmul.f32 %v1494_v61, %v655_v48  ;;  %v672_v15 = vmul.f32 %v1577_v42, %v640_v4  ;;  %v641_v9 = vadd.f32 0.5, %v609_v26 }
 0x14e   :  { %v1266_v57 = vpop.eup %1265  ;;  %v595_v59 = vmul.f32 0.5, %v1264_v53  ;;  %1285 = vtanh.f32 %v534_v28  ;;  %v656_v0 = vmul.f32 %v1571_v30, %v624_v54  ;;  %v625_v38 = vadd.f32 0.5, %v593_v22 }
 0x14f   :  { %v1268_v60 = vpop.eup %1267  ;;  %v611_v62 = vmul.f32 0.5, %v1266_v57  ;;  %793 = vadd.xlane.f32.xlu1 %v737_v46  ;;  %761 = vadd.xlane.f32.xlu0 %v721_v39  ;;  %1287 = vtanh.f32 %v550_v31  ;;  %v738_v3 = vmul.f32 %v1491_v55, %v672_v15  ;;  %v673_v6 = vmul.f32 %v1592_v5, %v641_v9 }
 0x150   :  { %v1270_v1 = vpop.eup %1269  ;;  %v642_v58 = vadd.f32 0.5, %v610_v50  ;;  %v626_v7 = vadd.f32 0.5, %v594_v44  ;;  %1289 = vtanh.f32 %v403_v56  ;;  %v722_v42 = vmul.f32 %v1494_v61, %v656_v0 }
 0x151   :  { %v1272_v35 = vpop.eup %1271  ;;  %v657_v52 = vmul.f32 %v1588_v63, %v625_v38  ;;  %1291 = vtanh.f32 %v483_v21  ;;  %v739_v12 = vmul.f32 %v1491_v55, %v673_v6  ;;  %v643_v13 = vadd.f32 0.5, %v611_v62 }
 0x152   :  { %v1274_v29 = vpop.eup %1273  ;;  %v627_v30 = vadd.f32 0.5, %v595_v59  ;;  %v674_v16 = vmul.f32 %v1256_v11, %v642_v58  ;;  %v658_v17 = vmul.f32 %v1600_v20, %v626_v7 }
 0x153   :  { %v1276_v14 = vpop.eup %1275  ;;  %v596_v24 = vmul.f32 0.5, %v1274_v29  ;;  %795 = vadd.xlane.f32.xlu1 %v738_v3  ;;  %763 = vadd.xlane.f32.xlu0 %v722_v42  ;;  %v723_v5 = vmul.f32 %v1494_v61, %v657_v52  ;;  %v675_v23 = vmul.f32 %v1268_v60, %v643_v13  ;;  %v1668_v29 = vand.u32 127, %v108_v33 }
 0x154   :  { %v1278_v18 = vpop.eup %1277  ;;  %v612_v19 = vmul.f32 0.5, %v1276_v14  ;;  %v740_v47 = vmul.f32 %v1491_v55, %v674_v16  ;;  %v724_v2 = vmul.f32 %v1494_v61, %v658_v17  ;;  %v659_v26 = vmul.f32 %v1262_v49, %v627_v30 }
 0x155   :  { %v1280_v22 = vpop.eup %1279  ;;  %v628_v63 = vadd.f32 0.5, %v596_v24  ;;  %v741_v11 = vmul.f32 %v1491_v55, %v675_v23  ;;  %v848_v30 = vadd.s32 4294967288, %v1668_v29  ;;  %v862_v16 = vadd.s32 4294967272, %v1668_v29 }
 0x156   :  { %v1282_v8 = vpop.eup %1281  ;;  %v644_v27 = vadd.f32 0.5, %v612_v19  ;;  %v725_v40 = vmul.f32 %v1494_v61, %v659_v26  ;;  %v846_v17 = vsub.s32 %v1668_v29, %v1444_v34  ;;  %v876_v19 = vadd.s32 4294967256, %v1668_v29 }
 0x157   :  { %797 = vadd.xlane.f32.xlu1 %v739_v12  ;;  %765 = vadd.xlane.f32.xlu0 %v723_v5  ;;  %v1284_v25 = vpop.eup %1283  ;;  %v597_v32 = vmul.f32 0.5, %v1282_v8  ;;  %v660_v20 = vmul.f32 %v1270_v1, %v628_v63  ;;  %v855_v5 = vadd.s32 4294967280, %v1668_v29  ;;  %v851_v33 = vsub.s32 %v848_v30, %v1444_v34 }
 0x158   :  { %v613_v36 = vmul.f32 0.5, %v1284_v25  ;;  %v676_v41 = vmul.f32 %v1272_v35, %v644_v27  ;;  %v890_v23 = vadd.s32 4294967240, %v1668_v29  ;;  %v897_v63 = vadd.s32 4294967232, %v1668_v29 }
 0x159   :  { %v629_v56 = vadd.f32 0.5, %v597_v32  ;;  %v726_v48 = vmul.f32 %v1494_v61, %v660_v20  ;;  %v904_v8 = vadd.s32 4294967224, %v1668_v29  ;;  %v858_v26 = vsub.s32 %v855_v5, %v1444_v34 }
 0x15a   :  { %v645_v43 = vadd.f32 0.5, %v613_v36  ;;  %v742_v28 = vmul.f32 %v1491_v55, %v676_v41  ;;  %v865_v27 = vsub.s32 %v862_v16, %v1444_v34  ;;  %v911_v25 = vadd.s32 4294967216, %v1668_v29 }
 0x15b   :  { %v1286_v37 = vpop.eup %1285  ;;  %799 = vadd.xlane.f32.xlu1 %v740_v47  ;;  %767 = vadd.xlane.f32.xlu0 %v724_v2  ;;  %v661_v4 = vmul.f32 %v1278_v18, %v629_v56  ;;  %v869_v18 = vadd.s32 4294967264, %v1668_v29  ;;  %v918_v32 = vadd.s32 4294967208, %v1668_v29  ;;  %v932_v20 = vadd.s32 4294967192, %v1668_v29 }
 0x15c   :  { %v1288_v51 = vpop.eup %1287  ;;  %v598_v10 = vmul.f32 0.5, %v1286_v37  ;;  %v677_v31 = vmul.f32 %v1280_v22, %v645_v43  ;;  %v883_v22 = vadd.s32 4294967248, %v1668_v29  ;;  %v879_v37 = vsub.s32 %v876_v19, %v1444_v34 }
 0x15d   :  { %v614_v44 = vmul.f32 0.5, %v1288_v51  ;;  %v1290_v45 = vpop.eup %1289  ;;  %v727_v57 = vmul.f32 %v1494_v61, %v661_v4  ;;  %v872_v36 = vsub.s32 %v869_v18, %v1444_v34  ;;  %v893_v41 = vsub.s32 %v890_v23, %v1444_v34 }
 0x15e   :  { %v630_v49 = vadd.f32 0.5, %v598_v10  ;;  %v1292_v50 = vpop.eup %1291  ;;  %v743_v54 = vmul.f32 %v1491_v55, %v677_v31  ;;  %v1705_v43 = vsub.s32 %v897_v63, %v1444_v34  ;;  %v1708_v56 = vsub.s32 %v904_v8, %v1444_v34 }
 0x15f   :  { %801 = vadd.xlane.f32.xlu1 %v741_v11  ;;  %769 = vadd.xlane.f32.xlu0 %v725_v40  ;;  %v646_v53 = vadd.f32 0.5, %v614_v44  ;;  %v925_v11 = vadd.s32 4294967200, %v1668_v29  ;;  %v886_v40 = vsub.s32 %v883_v22, %v1444_v34  ;;  %v939_v44 = vadd.s32 4294967184, %v1668_v29 }
 0x160   :  { %v662_v21 = vmul.f32 %v1290_v45, %v630_v49  ;;  %v946_v45 = vadd.s32 4294967176, %v1668_v29 }
 0x161   :  { %v678_v46 = vmul.f32 %v1292_v50, %v646_v53  ;;  %v1719_v50 = vsub.s32 %v911_v25, %v1444_v34  ;;  %v1727_v53 = vsub.s32 %v925_v11, %v1444_v34 }
 0x162   :  { %v728_v39 = vmul.f32 %v1494_v61, %v662_v21  ;;  %v1730_v21 = vsub.s32 %v932_v20, %v1444_v34  ;;  %v1742_v30 = vsub.s32 %v946_v45, %v1444_v34 }
 0x163   :  { %803 = vadd.xlane.f32.xlu1 %v742_v28  ;;  %771 = vadd.xlane.f32.xlu0 %v726_v48  ;;  %v744_v59 = vmul.f32 %v1491_v55, %v678_v46  ;;  %v1722_v28 = vsub.s32 %v918_v32, %v1444_v34 }
 0x167   :  { %805 = vadd.xlane.f32.xlu1 %v743_v54  ;;  %773 = vadd.xlane.f32.xlu0 %v727_v57 }
 0x16b   :  { %807 = vadd.xlane.f32.xlu1 %v744_v59  ;;  %775 = vadd.xlane.f32.xlu0 %v728_v39 }
 0x1b2   :  { %v1635_v15 = vpop.xlane.xlu1 %777  ;;  %v1637_v9 = vpop.xlane.xlu0 %745 }
 0x1b3   :  { %v956_v46 = vrot.slane %v1635_v15, %v846_v17  ;;  %v847_v39 = vrot.slane %v1637_v9, %v846_v17 }
 0x1b6   :  { %v1639_v60 = vpop.xlane.xlu1 %779  ;;  %v1641_v62 = vpop.xlane.xlu0 %747 }
 0x1b7   :  { %v960_v48 = vrot.slane %v1639_v60, %v851_v33  ;;  %v852_v49 = vrot.slane %v1641_v62, %v851_v33 }
 0x1b9   :  { %v961_v15 = vsel %vm853_vm0, %v960_v48, %v956_v46  ;;  %v854_v9 = vsel %vm853_vm0, %v852_v49, %v847_v39  ;;  %vm811_vm0 = vcmp.lt.s32.totalorder %v1668_v29, 16 }
 0x1bc   :  { %v1643_v0 = vpop.xlane.xlu1 %781  ;;  %v1645_v38 = vpop.xlane.xlu0 %749 }
 0x1bd   :  { %v965_v31 = vrot.slane %v1643_v0, %v858_v26  ;;  %v859_v4 = vrot.slane %v1645_v38, %v858_v26  ;;  %v1739_v38 = vsub.s32 %v939_v44, %v1444_v34 }
 0x1c0   :  { %v1647_v1 = vpop.xlane.xlu1 %783  ;;  %v1649_v61 = vpop.xlane.xlu0 %751 }
 0x1c1   :  { %v970_v54 = vrot.slane %v1647_v1, %v865_v27  ;;  %v866_v57 = vrot.slane %v1649_v61, %v865_v27 }
 0x1c4   :  { %v1651_v55 = vpop.xlane.xlu1 %785 }
 0x1c5   :  { %v975_v59 = vrot.slane %v1651_v55, %v872_v36  ;;  %v966_v55 = vsel %vm860_vm1, %v965_v31, %v961_v15 }
 0x1c6   :  { %v1653_v3 = vpop.xlane.xlu0 %753  ;;  %v971_v34 = vsel %vm867_vm2, %v970_v54, %v966_v55 }
 0x1c7   :  { %v873_v60 = vrot.slane %v1653_v3, %v872_v36  ;;  %v861_v3 = vsel %vm860_vm1, %v859_v4, %v854_v9  ;;  %vm1036_vm1 = vcmask 1041408  }
 0x1c8   :  { %v868_v17 = vsel %vm867_vm2, %v866_v57, %v861_v3 }
 0x1c9   :  { %v875_v18 = vsel %vm874_vm3, %v873_v60, %v868_v17 }
 0x1ca   :  { %v1655_v6 = vpop.xlane.xlu1 %787 }
 0x1cb   :  { %v1657_v58 = vpop.xlane.xlu0 %755  ;;  %v980_v1 = vrot.slane %v1655_v6, %v879_v37 }
 0x1cc   :  { %v880_v61 = vrot.slane %v1657_v58, %v879_v37  ;;  %v976_v58 = vsel %vm874_vm3, %v975_v59, %v971_v34 }
 0x1cd   :  { %v981_v23 = vsel %vm881_vm4, %v980_v1, %v976_v58 }
 0x1ce   :  { %v882_v63 = vsel %vm881_vm4, %v880_v61, %v875_v18 }
 0x1cf   :  { %v1659_v7 = vpop.xlane.xlu1 %789  ;;  %v1661_v35 = vpop.xlane.xlu0 %757 }
 0x1d0   :  { %v985_v5 = vrot.slane %v1659_v7, %v886_v40  ;;  %v887_v16 = vrot.slane %v1661_v35, %v886_v40 }
 0x1d2   :  { %v986_v8 = vsel %vm888_vm5, %v985_v5, %v981_v23  ;;  %v889_v26 = vsel %vm888_vm5, %v887_v16, %v882_v63 }
 0x1d3   :  { %v1663_v42 = vpop.xlane.xlu1 %791 }
 0x1d4   :  { %v1665_v52 = vpop.xlane.xlu0 %759  ;;  %v990_v33 = vrot.slane %v1663_v42, %v893_v41 }
 0x1d5   :  { %v894_v6 = vrot.slane %v1665_v52, %v893_v41 }
 0x1d6   :  { %v991_v27 = vsel %vm895_vm6, %v990_v33, %v986_v8 }
 0x1d7   :  { %v896_v25 = vsel %vm895_vm6, %v894_v6, %v889_v26 }
 0x1d8   :  { %v1670_v12 = vpop.xlane.xlu1 %793  ;;  %v1672_v13 = vpop.xlane.xlu0 %761 }
 0x1d9   :  { %v995_v19 = vrot.slane %v1670_v12, %v1705_v43  ;;  %v901_v7 = vrot.slane %v1672_v13, %v1705_v43 }
 0x1db   :  { %v996_v32 = vsel %vm902_vm7, %v995_v19, %v991_v27  ;;  %v903_v36 = vsel %vm902_vm7, %v901_v7, %v896_v25 }
 0x1dc   :  { %v1675_v14 = vpop.xlane.xlu1 %795  ;;  %v1677_v24 = vpop.xlane.xlu0 %763 }
 0x1dd   :  { %v1000_v42 = vrot.slane %v1675_v14, %v1708_v56  ;;  %v908_v52 = vrot.slane %v1677_v24, %v1708_v56 }
 0x1df   :  { %v1001_v37 = vsel %vm909_vm8, %v1000_v42, %v996_v32  ;;  %v910_v40 = vsel %vm909_vm8, %v908_v52, %v903_v36 }
 0x1e0   :  { %v1690_v47 = vpop.xlane.xlu1 %797  ;;  %v1692_v2 = vpop.xlane.xlu0 %765 }
 0x1e1   :  { %v1005_v12 = vrot.slane %v1690_v47, %v1719_v50  ;;  %v915_v13 = vrot.slane %v1692_v2, %v1719_v50 }
 0x1e3   :  { %v1006_v56 = vsel %vm916_vm9, %v1005_v12, %v1001_v37 }
 0x1e4   :  { %v1710_v51 = vpop.xlane.xlu1 %799  ;;  %v1712_v10 = vpop.xlane.xlu0 %767 }
 0x1e5   :  { %v1010_v14 = vrot.slane %v1710_v51, %v1722_v28  ;;  %v922_v24 = vrot.slane %v1712_v10, %v1722_v28  ;;  %v917_v51 = vsel %vm916_vm9, %v915_v13, %v910_v40 }
 0x1e7   :  { %v1011_v45 = vsel %vm923_vm10, %v1010_v14, %v1006_v56  ;;  %v924_v48 = vsel %vm923_vm10, %v922_v24, %v917_v51 }
 0x1e8   :  { %v802_v62 = vpop.xlane.xlu1 %801  ;;  %v770_v0 = vpop.xlane.xlu0 %769 }
 0x1e9   :  { %v1015_v11 = vrot.slane %v802_v62, %v1727_v53  ;;  %v929_v47 = vrot.slane %v770_v0, %v1727_v53 }
 0x1eb   :  { %v1016_v49 = vsel %vm930_vm11, %v1015_v11, %v1011_v45  ;;  %v931_v50 = vsel %vm930_vm11, %v929_v47, %v924_v48 }
 0x1ec   :  { %v804_v35 = vpop.xlane.xlu1 %803  ;;  %v772_v22 = vpop.xlane.xlu0 %771 }
 0x1ed   :  { %v1020_v41 = vrot.slane %v804_v35, %v1730_v21  ;;  %v936_v43 = vrot.slane %v772_v22, %v1730_v21 }
 0x1ef   :  { %v1021_v4 = vsel %vm937_vm12, %v1020_v41, %v1016_v49  ;;  %v938_v53 = vsel %vm937_vm12, %v936_v43, %v931_v50 }
 0x1f0   :  { %v806_v20 = vpop.xlane.xlu1 %805  ;;  %v774_v2 = vpop.xlane.xlu0 %773 }
 0x1f1   :  { %v1025_v10 = vrot.slane %v806_v20, %v1739_v38  ;;  %v943_v44 = vrot.slane %v774_v2, %v1739_v38 }
 0x1f3   :  { %v1026_v39 = vsel %vm944_vm13, %v1025_v10, %v1021_v4  ;;  %v945_v54 = vsel %vm944_vm13, %v943_v44, %v938_v53 }
 0x1f4   :  { %v808_v28 = vpop.xlane.xlu1 %807  ;;  %v776_v31 = vpop.xlane.xlu0 %775 }
 0x1f5   :  { %v1030_v21 = vrot.slane %v808_v28, %v1742_v30  ;;  %v950_v46 = vrot.slane %v776_v31, %v1742_v30 }
 0x1f7   :  { %v952_v57 = vsel %vm951_vm14, %v950_v46, %v945_v54  ;;  %v1031_v59 = vsel %vm951_vm14, %v1030_v21, %v1026_v39 }
 0x1f8   :  { %v1033_v60 = vsel %vm1032_vm15, %v1031_v59, %v952_v57 }
 0x1f9   :  { %v1035_v62 = vsel %vm811_vm0, %v1033_v60, -1e+30 }
 0x1fa   :  { %v1037_v0 = vsel %vm1036_vm1, %v1035_v62, -inf }
 0x1fb   :  { %1038 = vmax.xlane.f32.xlu0 %v1037_v0 }
 0x284   :  { %v1039_v38 = vpop.xlane.xlu0 %1038 }
 0x285   :  { %v1040_v15 = vsub.f32 %v1035_v62, %v1039_v38 }
 0x287   :  { %v1041_v9 = vmul.f32 1.442695, %v1040_v15 }
 0x289   :  { %1293 = vpow2.f32 %v1041_v9 }
 0x296   :  { %v1294_v1 = vpop.eup %1293 }
 0x297   :  { %v1043_v61 = vsel %vm1036_vm1, %v1294_v1, 0.0 }
 0x298   :  { %1044 = vadd.xlane.f32.xlu1 %v1043_v61 }
 0x321   :  { %v1045_v55 = vpop.xlane.xlu1 %1044 }
 0x322   :  { %1295 = vrcp.f32 %v1045_v55 }
 0x32f   :  { %v1296_v30 = vpop.eup %1295 }
 0x330   :  { %v1048_v29 = vmul.f32 %v1296_v30, %v1294_v1 }
 0x332   :  { %1049 = vst [vmem:[#allocation8] sm:$0x3] %v1048_v29 }
 0x333   :  { %1368 = shalt.err (!%p1365_p5)
}
 0x334   :  { %1059 = dma.vmem_to_hbm [thread:$0]  %s1057_s7, 32, %s1808_s4, [#allocation4]  }
 0x335   :  { %1381 = dma.done.wait [#allocation4], 32  }
 0x336   :  { %1382 = vsyncadd [#allocation4], 4294967264 }
 0x337   :  { %1063 = vsyncpa [#allocation3], 1 }
 0x338   :  { %1064 = vsyncpa [#allocation6], 1 }
 0x339   :  { %1065 = vsyncpa [#allocation4], 1 }

</bundles_post_ra>
